<compile_context>
chip_gen: v5e
topology: v5e:2x2
jax: 0.10.0
libtpu: 0.0.40
codegen_flags: <defaults>
</compile_context>

<pallas_src>
import functools

import jax
import jax.numpy as jnp
from jax.experimental import pallas as pl
from jax.experimental.pallas import tpu as pltpu


def _round_up(x, m):
    return ((x + m - 1) // m) * m


# ----------------------------- kernels ------------------------------------ #
def conv_stats_kernel(p_ref, w_ref, stats_ref):
    """Per M-tile: bf16 matmul (f32 accum) -> per-channel partial sum and
    sum-of-squares only.  Pre-BN activations are never written to HBM; they
    are recomputed in pass 2."""
    y = jnp.dot(p_ref[...], w_ref[...], preferred_element_type=jnp.float32)
    stats_ref[0:1, :] = jnp.sum(y, axis=0, keepdims=True)
    stats_ref[1:2, :] = jnp.sum(y * y, axis=0, keepdims=True)
    # rows 2..7 intentionally left untouched (never read on the host)


def conv_bn_act_kernel(p_ref, w_ref, ss_ref, ot_ref, *, slope):
    """Per M-tile: recompute the matmul, apply the folded BN scale/shift FMA
    and (static-slope) leaky_relu, transpose to (Cp, tM) and store so the
    trailing XLA NCHW transpose moves contiguous rows."""
    y = jnp.dot(p_ref[...], w_ref[...], preferred_element_type=jnp.float32)
    z = y * ss_ref[0:1, :] + ss_ref[1:2, :]
    if slope != 1.0:                      # static: active=False -> FMA only
        z = jnp.where(z > 0, z, slope * z)
    ot_ref[...] = z.T                     # XLU transpose; kernel is mem-bound


# ----------------------------- host side ---------------------------------- #
def _im2col_reflect_bf16(x, kh, kw, stride, pad, M_pad, Kp):
    """x: (N, Cin, H, W) f32 -> bf16 patches (M_pad, Kp), zero-padded.
    K order = (Cin, kh, kw) to match weight.reshape(Cout, Cin*kh*kw)."""
    xp = jnp.pad(x.astype(jnp.bfloat16),
                 ((0, 0), (0, 0), (pad[0], pad[0]), (pad[1], pad[1])),
                 mode="reflect")                 # PADDING_MODE = 'reflect'
    N, C, Hp, Wp = xp.shape
    Ho = (Hp - kh) // stride + 1
    Wo = (Wp - kw) // stride + 1
    cols = [xp[:, :, i:i + stride * Ho:stride, j:j + stride * Wo:stride]
            for i in range(kh) for j in range(kw)]
    p = jnp.stack(cols, axis=2).reshape(N, C * kh * kw, Ho, Wo)
    p = p.transpose(0, 2, 3, 1).reshape(N * Ho * Wo, C * kh * kw)
    return jnp.pad(p, ((0, M_pad - N * Ho * Wo), (0, Kp - C * kh * kw)))


def _pick_tile_m(M):
    """Multiple of 128 (transposed output block needs lane-dense tM), <= 1024
    rows, and small enough that >=2 tiles exist when M allows so the
    'parallel' grid axis can feed both v7x TensorCores."""
    m128 = _round_up(M, 128)
    if m128 <= 128:
        return 128
    return min(1024, _round_up((m128 + 1) // 2, 128))


def _vmem_bytes(tM, Kp, Cp):
    return (2 * tM * Kp * 2        # patches tile, bf16, double-buffered
            + 2 * Kp * Cp * 2      # weights, bf16 (counted double-buffered)
            + 2 * Cp * tM * 4      # output tile, f32, double-buffered
            + 4 * 8 * Cp * 4)      # stats + scale/shift blocks


def d_conv_bn_active(x, weight, bias, gamma, beta, *, stride=2, padding=(0, 0),
                     bn=True, active=True, negative_slope=0.01):
    """Forward of D_conv_bn_active. x: (N, Cin, H, W) f32. Returns NCHW f32."""
    Cout, Cin, kh, kw = weight.shape
    N, _, H, W = x.shape
    Ho = (H + 2 * padding[0] - kh) // stride + 1
    Wo = (W + 2 * padding[1] - kw) // stride + 1
    M = N * Ho * Wo
    K = Cin * kh * kw

    Kp = _round_up(K, 128)                 # lane-aligned contraction dim
    Cp = _round_up(Cout, 128)              # lane-dense output channels

    tM = _pick_tile_m(M)
    while tM > 128 and _vmem_bytes(tM, Kp, Cp) > 40 * 1024 * 1024:
        tM = _round_up(tM // 2, 128)       # shrink until it fits v7x VMEM
    M_pad = _round_up(M, tM)
    n_tiles = M_pad // tM
    vmem_limit = min(max(2 * _vmem_bytes(tM, Kp, Cp) + (8 << 20), 32 << 20),
                     48 << 20)
    cparams = pltpu.CompilerParams(dimension_semantics=("parallel",),
                                   vmem_limit_bytes=vmem_limit)

    # bf16 MXU operands, built already padded. Zero-padded rows/cols contribute
    # exactly 0 to y and to the BN stats (conv bias is folded into `shift`).
    patches = _im2col_reflect_bf16(x, kh, kw, stride, padding, M_pad, Kp)
    w2d = jnp.pad(weight.reshape(Cout, K).T,
                  ((0, Kp - K), (0, Cp - Cout))).astype(jnp.bfloat16)

    if bn:
        # -------- pass 1: stats only (per-tile per-channel sum / sumsq) ---- #
        stats = pl.pallas_call(
            conv_stats_kernel,
            out_shape=jax.ShapeDtypeStruct((n_tiles * 8, Cp), jnp.float32),
            grid_spec=pltpu.PrefetchScalarGridSpec(
                num_scalar_prefetch=0,
                grid=(n_tiles,),
                in_specs=[
                    pl.BlockSpec((tM, Kp), lambda i: (i, 0)),
                    pl.BlockSpec((Kp, Cp), lambda i: (0, 0)),
                ],
                out_specs=pl.BlockSpec((8, Cp), lambda i: (i, 0)),
            ),
            compiler_params=cparams,
        )(patches, w2d)

        # ---- tiny reduction + fold BN into one scale/shift FMA ------------ #
        stats = stats.reshape(n_tiles, 8, Cp)
        s1 = stats[:, 0, :].sum(axis=0)
        s2 = stats[:, 1, :].sum(axis=0)
        # Conv bias cancels against the training-mode BN mean subtraction, so
        # it is never added in either pass.
        # NOTE: E[y^2] - E[y]^2 in f32 loses precision for very large M.
        mean = s1 / M
        var = jnp.maximum(s2 / M - mean * mean, 0.0)   # biased var (PyTorch)
        g_p = jnp.pad(gamma.astype(jnp.float32), (0, Cp - Cout))
        b_p = jnp.pad(beta.astype(jnp.float32), (0, Cp - Cout))
        scale = g_p * jax.lax.rsqrt(var + 1e-5)
        shift = b_p - mean * scale
    else:
        scale = jnp.ones((Cp,), jnp.float32)
        shift = jnp.pad(bias.astype(jnp.float32), (0, Cp - Cout))

    ss = jnp.concatenate([scale[None, :], shift[None, :],
                          jnp.zeros((6, Cp), jnp.float32)], axis=0)
    slope = float(negative_slope) if active else 1.0   # static, baked in

    # -------- pass 2: recompute matmul + scale/shift + leaky, transposed --- #
    out_t = pl.pallas_call(
        functools.partial(conv_bn_act_kernel, slope=slope),
        out_shape=jax.ShapeDtypeStruct((Cp, M_pad), jnp.float32),
        grid_spec=pltpu.PrefetchScalarGridSpec(
            num_scalar_prefetch=0,
            grid=(n_tiles,),
            in_specs=[
                pl.BlockSpec((tM, Kp), lambda i: (i, 0)),
                pl.BlockSpec((Kp, Cp), lambda i: (0, 0)),
                pl.BlockSpec((8, Cp), lambda i: (0, 0)),
            ],
            out_specs=pl.BlockSpec((Cp, tM), lambda i: (0, i)),
        ),
        compiler_params=cparams,
    )(patches, w2d, ss)

    # Cheap epilogue: (Cp, M_pad) -> NCHW moves contiguous Ho*Wo rows.
    out = out_t[:Cout, :M].reshape(Cout, N, Ho, Wo).transpose(1, 0, 2, 3)
    return out


# ----------------------------- reference ---------------------------------- #
def _reference(x, weight, bias, gamma, beta, stride, padding):
    xp = jnp.pad(x, ((0, 0), (0, 0), (padding[0], padding[0]),
                     (padding[1], padding[1])), mode="reflect")
    y = jax.lax.conv_general_dilated(
        xp, weight, (stride, stride), "VALID",
        dimension_numbers=("NCHW", "OIHW", "NCHW"))
    y = y + bias[None, :, None, None]
    mean = y.mean(axis=(0, 2, 3), keepdims=True)
    var = ((y - mean) ** 2).mean(axis=(0, 2, 3), keepdims=True)
    y = (y - mean) * jax.lax.rsqrt(var + 1e-5)
    y = y * gamma[None, :, None, None] + beta[None, :, None, None]
    return jnp.where(y > 0, y, 0.01 * y)


if __name__ == "__main__":
    key = jax.random.PRNGKey(0)
    k_x, k_w, k_b = jax.random.split(key, 3)

    # filter_size=(5,5), stride=2, padding=(2,2), reflect pad, bn=True, active=True
    N, Cin, H, W = 2, 4, 16, 16
    Cout, kh, kw = 8, 5, 5

    x = jax.random.normal(k_x, (N, Cin, H, W), dtype=jnp.float32)

    fan_in = Cin * kh * kw
    bound = 1.0 / (fan_in ** 0.5)
    weight = jax.random.uniform(k_w, (Cout, Cin, kh, kw), jnp.float32,
                                minval=-bound, maxval=bound)
    bias = jax.random.uniform(k_b, (Cout,), jnp.float32,
                              minval=-bound, maxval=bound)
    gamma = jnp.ones((Cout,), jnp.float32)
    beta = jnp.zeros((Cout,), jnp.float32)

    out = d_conv_bn_active(x, weight, bias, gamma, beta,
                           stride=2, padding=(2, 2), bn=True, active=True)
    jax.block_until_ready(out)
    assert out.shape == (N, Cout, 8, 8), out.shape

    # Loose sanity check vs f32 reference (kernel matmul runs in bf16).
    ref = _reference(x, weight, bias, gamma, beta, 2, (2, 2))
    err = float(jnp.max(jnp.abs(out - ref)))
    assert err < 0.25, f"max abs err too large: {err}"
    print("KERNEL_OK")
</pallas_src>

<mosaic_0001>
module attributes {stable_mosaic.version = 11 : i64} {
  func.func @conv_stats_kernel(%arg0: i32, %arg1: memref<128x128xbf16, #tpu.memory_space<vmem>>, %arg2: memref<128x128xbf16, #tpu.memory_space<vmem>>, %arg3: memref<8x128xf32, #tpu.memory_space<vmem>>) attributes {dimension_semantics = [#tpu.dimension_semantics<parallel>], iteration_bounds = array<i64: 1>, scalar_prefetch = 0 : i64, scratch_operands = 0 : i64, tpu.core_type = #tpu.core_type<tc>, window_params = [{transform_indices = @transform_0, window_bounds = array<i64: 128, 128>}, {pipeline_mode = #tpu.pipeline_mode<synchronous>, transform_indices = @transform_1, window_bounds = array<i64: 128, 128>}, {transform_indices = @transform_2, window_bounds = array<i64: 8, 128>}]} {
    %c0 = arith.constant 0 : index
    %c0_0 = arith.constant 0 : index
    %0 = vector.load %arg1[%c0, %c0_0] : memref<128x128xbf16, #tpu.memory_space<vmem>>, vector<128x128xbf16>
    %c0_1 = arith.constant 0 : index
    %c0_2 = arith.constant 0 : index
    %1 = vector.load %arg2[%c0_1, %c0_2] : memref<128x128xbf16, #tpu.memory_space<vmem>>, vector<128x128xbf16>
    %cst = arith.constant dense<0.000000e+00> : vector<128x128xf32>
    %2 = tpu.matmul %0, %1, %cst {dimension_numbers = #tpu.dot_dimension_numbers<[1], [0], [0], [1], [0, 0, 1, 1], [], []>} : vector<128x128xbf16>, vector<128x128xbf16>, vector<128x128xf32> -> vector<128x128xf32>
    %cst_3 = arith.constant dense<0.000000e+00> : vector<128xf32>
    %3 = vector.multi_reduction <add>, %2, %cst_3 [0] : vector<128x128xf32> to vector<128xf32>
    %4 = vector.shape_cast %3 : vector<128xf32> to vector<1x128xf32>
    %c0_4 = arith.constant 0 : index
    %c0_5 = arith.constant 0 : index
    %5 = vector.load %arg3[%c0_4, %c0_5] : memref<8x128xf32, #tpu.memory_space<vmem>>, vector<1x128xf32>
    tpu.vector_store %arg3[%c0_4, %c0_5], %4 {strides = array<i32>} : memref<8x128xf32, #tpu.memory_space<vmem>>, vector<1x128xf32>,
    %6 = arith.mulf %2, %2 : vector<128x128xf32>
    %cst_6 = arith.constant dense<0.000000e+00> : vector<128xf32>
    %7 = vector.multi_reduction <add>, %6, %cst_6 [0] : vector<128x128xf32> to vector<128xf32>
    %8 = vector.shape_cast %7 : vector<128xf32> to vector<1x128xf32>
    %c1 = arith.constant 1 : index
    %c0_7 = arith.constant 0 : index
    %9 = vector.load %arg3[%c1, %c0_7] : memref<8x128xf32, #tpu.memory_space<vmem>>, vector<1x128xf32>
    tpu.vector_store %arg3[%c1, %c0_7], %8 {strides = array<i32>} : memref<8x128xf32, #tpu.memory_space<vmem>>, vector<1x128xf32>,
    return
  }
  func.func @transform_0(%arg0: i32) -> (i32, i32) {
    %c0_i32 = arith.constant 0 : i32
    %c0_i32_0 = arith.constant 0 : i32
    return %arg0, %c0_i32 : i32, i32
  }
  func.func @transform_1(%arg0: i32) -> (i32, i32) {
    %c0_i32 = arith.constant 0 : i32
    %c0_i32_0 = arith.constant 0 : i32
    %c0_i32_1 = arith.constant 0 : i32
    return %c0_i32, %c0_i32_0 : i32, i32
  }
  func.func @transform_2(%arg0: i32) -> (i32, i32) {
    %c0_i32 = arith.constant 0 : i32
    %c0_i32_0 = arith.constant 0 : i32
    return %arg0, %c0_i32 : i32, i32
  }
}

</mosaic_0001>

<bundles_post_ra>
// kernel: tpu_custom_call.1
= control target key start
LH: loop header
LB: loop body
LE: loop exit
PB: predicated region body
PF: predicated region fallthrough
CT: control target
= control target key end

     0   :  { %7 = vsyncpa [#allocation3], 0  ;;  %s515_s0 = inlined_call_operand.hbm [shape: bf16[128,128], index: 0, kind: input, shape index: {}]   ;;  %s516_s1 = inlined_call_operand.hbm [shape: bf16[128,128], index: 1, kind: input, shape index: {}]   ;;  %s517_s2 = inlined_call_operand.hbm [shape: f32[8,128], index: 2, kind: output, shape index: {}]  }
   0x1   :  { %8 = vsyncpa [#allocation6], 0 }
   0x2   :  { %9 = vsyncpa [#allocation4], 0  ;;  %s14_s11 = sshll.u32 %s515_s0, 4  ;;  %s486_s12 = smov [#allocation2]   ;;  %s15_s11 = int_to_ptr.hbm [resolvable:$true] %s14_s11 }
   0x3   :  { %s16_s13 = sshll.u32 %s486_s12, 4  ;;  %s27_s16 = sshll.u32 %s516_s1, 4  ;;  %s17_s13 = int_to_ptr.vmem [resolvable:$true] %s16_s13  ;;  %s28_s16 = int_to_ptr.hbm [resolvable:$true] %s27_s16 }
   0x4   :  { %s487_s17 = smov 64   ;;  %s488_s18 = smov 4  }
   0x5   :  { %22 = dma.hbm_to_vmem [thread:$0]  %s15_s11, 1024, %s17_s13, [#allocation3], %s487_s17, %s487_s17, %s488_s18  }
   0x6   :  { %s489_s19 = smov [#allocation5]  }
   0x7   :  { %s29_s20 = sshll.u32 %s489_s19, 4  ;;  %s30_s20 = int_to_ptr.vmem [resolvable:$true] %s29_s20 }
   0x8   :  { %35 = dma.hbm_to_vmem [thread:$0]  %s28_s16, 1024, %s30_s20, [#allocation6], %s487_s17, %s487_s17, %s488_s18  }
   0x9   :  { %480 = dma.done.wait [#allocation3], 1024  }
   0xa   :  { %481 = vsyncadd [#allocation3], 4294966272 }
   0xb   :  { %482 = dma.done.wait [#allocation6], 1024  }
   0xc   :  { %483 = vsyncadd [#allocation6], 4294966272  ;;  %v378_v0 = vld [vmem:[#allocation5 + $0x38] sm:$0xff]  ;;  %v377_v1 = vld [vmem:[#allocation5 + $0x30] sm:$0xff]  ;;  %s490_s0 = smov [#allocation7]   ;;  %s288_s23 = sshll.u32 %s517_s2, 4  ;;  %s289_s23 = int_to_ptr.hbm [resolvable:$true] %s288_s23 }
   0xd   :  { %172 = vmatpush.bf16.msra.mxu0 %v378_v0  ;;  %379 = vmatpush.bf16.msra.mxu1 %v378_v0  ;;  %v376_v2 = vld [vmem:[#allocation5 + $0x28] sm:$0xff]  ;;  %v375_v3 = vld [vmem:[#allocation5 + $0x20] sm:$0xff]  ;;  %v374_v4 = vld [vmem:[#allocation5 + $0x18] sm:$0xff]  ;;  %s286_s1 = sshll.u32 %s490_s0, 4  ;;  %s287_s1 = int_to_ptr.vmem [resolvable:$true] %s286_s1 }
   0xe   :  { %380 = vmatpush.bf16.msra.mxu2 %v378_v0  ;;  %381 = vmatpush.bf16.msra.mxu3 %v378_v0  ;;  %v373_v5 = vld [vmem:[#allocation5 + $0x10] sm:$0xff]  ;;  %v372_v6 = vld [vmem:[#allocation5 + $0x8] sm:$0xff]  ;;  %v371_v7 = vld [vmem:[#allocation5] sm:$0xff] }
   0xf   :  { %v363_v8 = vld [vmem:[#allocation2] sm:$0xff]  ;;  %v365_v9 = vld [vmem:[#allocation2 + $0x10] sm:$0xff]  ;;  %v364_v12 = vld [vmem:[#allocation2 + $0x8] sm:$0xff] }
  0x10   :  { %v367_v10 = vld [vmem:[#allocation2 + $0x20] sm:$0xff]  ;;  %v369_v11 = vld [vmem:[#allocation2 + $0x30] sm:$0xff]  ;;  %v366_v13 = vld [vmem:[#allocation2 + $0x18] sm:$0xff] }
  0x11   :  { %173 = vmatpush.bf16.msra.mxu0 %v377_v1  ;;  %382 = vmatpush.bf16.msra.mxu1 %v377_v1  ;;  %v368_v14 = vld [vmem:[#allocation2 + $0x28] sm:$0xff]  ;;  %v370_v15 = vld [vmem:[#allocation2 + $0x38] sm:$0xff] }
  0x12   :  { %383 = vmatpush.bf16.msra.mxu2 %v377_v1  ;;  %384 = vmatpush.bf16.msra.mxu3 %v377_v1 }
  0x15   :  { %174 = vmatpush.bf16.msra.mxu0 %v376_v2  ;;  %385 = vmatpush.bf16.msra.mxu1 %v376_v2 }
  0x16   :  { %386 = vmatpush.bf16.msra.mxu2 %v376_v2  ;;  %387 = vmatpush.bf16.msra.mxu3 %v376_v2 }
  0x19   :  { %175 = vmatpush.bf16.msra.mxu0 %v375_v3  ;;  %388 = vmatpush.bf16.msra.mxu1 %v375_v3 }
  0x1a   :  { %389 = vmatpush.bf16.msra.mxu2 %v375_v3  ;;  %390 = vmatpush.bf16.msra.mxu3 %v375_v3 }
  0x1d   :  { %176 = vmatpush.bf16.msra.mxu0 %v374_v4  ;;  %391 = vmatpush.bf16.msra.mxu1 %v374_v4 }
  0x1e   :  { %392 = vmatpush.bf16.msra.mxu2 %v374_v4  ;;  %393 = vmatpush.bf16.msra.mxu3 %v374_v4 }
  0x21   :  { %177 = vmatpush.bf16.msra.mxu0 %v373_v5  ;;  %394 = vmatpush.bf16.msra.mxu1 %v373_v5 }
  0x22   :  { %395 = vmatpush.bf16.msra.mxu2 %v373_v5  ;;  %396 = vmatpush.bf16.msra.mxu3 %v373_v5 }
  0x25   :  { %178 = vmatpush.bf16.msra.mxu0 %v372_v6  ;;  %397 = vmatpush.bf16.msra.mxu1 %v372_v6 }
  0x26   :  { %398 = vmatpush.bf16.msra.mxu2 %v372_v6  ;;  %399 = vmatpush.bf16.msra.mxu3 %v372_v6 }
  0x29   :  { %179 = vmatpush.bf16.msra.mxu0 %v371_v7  ;;  %400 = vmatpush.bf16.msra.mxu1 %v371_v7 }
  0x2a   :  { %401 = vmatpush.bf16.msra.mxu2 %v371_v7  ;;  %402 = vmatpush.bf16.msra.mxu3 %v371_v7 }
  0x2c   :  { %180 = vmatmul.bf16.vlgmr.msra.gmra.mxu0 %v363_v8  ;;  %190 = vmatmul.bf16.vlgmr.msra.gmra.mxu1 %v365_v9 }
  0x2d   :  { %200 = vmatmul.bf16.vlgmr.msra.gmra.mxu2 %v367_v10  ;;  %210 = vmatmul.bf16.vlgmr.msra.gmra.mxu3 %v369_v11 }
  0x3c   :  { %185 = vmatmul.bf16.gmra.mxu0 %v364_v12  ;;  %195 = vmatmul.bf16.gmra.mxu1 %v366_v13 }
  0x3d   :  { %205 = vmatmul.bf16.gmra.mxu2 %v368_v14  ;;  %215 = vmatmul.bf16.gmra.mxu3 %v370_v15 }
  0xa9   :  { %v181_v16 = vpop.f32.mrf.mxu0  ;;  %v191_v17 = vpop.f32.mrf.mxu1 }
  0xaa   :  { %v243_v26 = vmul.f32 %v181_v16, %v181_v16  ;;  %v247_v36 = vmul.f32 %v191_v17, %v191_v17 }
  0xb0   :  { %v201_v19 = vpop.f32.mrf.mxu2  ;;  %v211_v22 = vpop.f32.mrf.mxu3 }
  0xb1   :  { %v183_v18 = vpop.f32.mrf.mxu0  ;;  %v193_v20 = vpop.f32.mrf.mxu1  ;;  %v251_v50 = vmul.f32 %v201_v19, %v201_v19  ;;  %v255_v0 = vmul.f32 %v211_v22, %v211_v22 }
  0xb2   :  { %v244_v24 = vmul.f32 %v183_v18, %v183_v18  ;;  %v221_v27 = vadd.f32 %v183_v18, %v181_v16  ;;  %v248_v40 = vmul.f32 %v193_v20, %v193_v20 }
  0xb4   :  { %v259_v29 = vadd.f32 %v244_v24, %v243_v26 }
  0xb8   :  { %v203_v23 = vpop.f32.mrf.mxu2  ;;  %v213_v35 = vpop.f32.mrf.mxu3 }
  0xb9   :  { %v186_v21 = vpop.f32.mrf.mxu0  ;;  %v196_v25 = vpop.f32.mrf.mxu1  ;;  %v252_v54 = vmul.f32 %v203_v23, %v203_v23  ;;  %v256_v3 = vmul.f32 %v213_v35, %v213_v35 }
  0xba   :  { %v245_v28 = vmul.f32 %v186_v21, %v186_v21  ;;  %v222_v30 = vadd.f32 %v221_v27, %v186_v21  ;;  %v249_v44 = vmul.f32 %v196_v25, %v196_v25 }
  0xbc   :  { %v260_v32 = vadd.f32 %v259_v29, %v245_v28 }
  0xc0   :  { %v206_v39 = vpop.f32.mrf.mxu2  ;;  %v216_v53 = vpop.f32.mrf.mxu3 }
  0xc1   :  { %v188_v31 = vpop.f32.mrf.mxu0  ;;  %v198_v43 = vpop.f32.mrf.mxu1  ;;  %v253_v59 = vmul.f32 %v206_v39, %v206_v39  ;;  %v257_v8 = vmul.f32 %v216_v53, %v216_v53 }
  0xc2   :  { %v223_v33 = vadd.f32 %v222_v30, %v188_v31  ;;  %v246_v34 = vmul.f32 %v188_v31, %v188_v31  ;;  %v250_v48 = vmul.f32 %v198_v43, %v198_v43 }
  0xc4   :  { %v224_v37 = vadd.f32 %v223_v33, %v191_v17  ;;  %v261_v38 = vadd.f32 %v260_v32, %v246_v34 }
  0xc6   :  { %v262_v41 = vadd.f32 %v261_v38, %v247_v36  ;;  %v225_v42 = vadd.f32 %v224_v37, %v193_v20 }
  0xc8   :  { %v226_v45 = vadd.f32 %v225_v42, %v196_v25  ;;  %v263_v46 = vadd.f32 %v262_v41, %v248_v40  ;;  %v208_v57 = vpop.f32.mrf.mxu2  ;;  %v218_v6 = vpop.f32.mrf.mxu3 }
  0xc9   :  { %v254_v63 = vmul.f32 %v208_v57, %v208_v57  ;;  %v258_v12 = vmul.f32 %v218_v6, %v218_v6 }
  0xca   :  { %v227_v47 = vadd.f32 %v226_v45, %v198_v43  ;;  %v264_v49 = vadd.f32 %v263_v46, %v249_v44 }
  0xcc   :  { %v228_v51 = vadd.f32 %v227_v47, %v201_v19  ;;  %v265_v52 = vadd.f32 %v264_v49, %v250_v48 }
  0xce   :  { %v266_v55 = vadd.f32 %v265_v52, %v251_v50  ;;  %v229_v56 = vadd.f32 %v228_v51, %v203_v23 }
  0xd0   :  { %v230_v58 = vadd.f32 %v229_v56, %v206_v39  ;;  %v267_v60 = vadd.f32 %v266_v55, %v252_v54 }
  0xd2   :  { %v268_v61 = vadd.f32 %v267_v60, %v253_v59  ;;  %v231_v62 = vadd.f32 %v230_v58, %v208_v57 }
  0xd4   :  { %v232_v1 = vadd.f32 %v231_v62, %v211_v22  ;;  %v269_v2 = vadd.f32 %v268_v61, %v254_v63 }
  0xd6   :  { %v270_v4 = vadd.f32 %v269_v2, %v255_v0  ;;  %v233_v5 = vadd.f32 %v232_v1, %v213_v35 }
  0xd8   :  { %v234_v7 = vadd.f32 %v233_v5, %v216_v53  ;;  %v271_v9 = vadd.f32 %v270_v4, %v256_v3 }
  0xda   :  { %v272_v10 = vadd.f32 %v271_v9, %v257_v8  ;;  %v235_v11 = vadd.f32 %v234_v7, %v218_v6 }
  0xdc   :  { %v236_v13 = vrot.slane %v235_v11, 4  ;;  %v273_v14 = vadd.f32 %v272_v10, %v258_v12 }
  0xde   :  { %v237_v15 = vadd.f32 %v236_v13, %v235_v11  ;;  %v274_v16 = vrot.slane %v273_v14, 4 }
  0xe0   :  { %v238_v17 = vrot.slane %v237_v15, 2  ;;  %v275_v18 = vadd.f32 %v274_v16, %v273_v14 }
  0xe2   :  { %v239_v19 = vadd.f32 %v238_v17, %v237_v15  ;;  %v276_v20 = vrot.slane %v275_v18, 2 }
  0xe4   :  { %v240_v21 = vrot.slane %v239_v19, 1  ;;  %v277_v22 = vadd.f32 %v276_v20, %v275_v18 }
  0xe6   :  { %v241_v23 = vadd.f32 %v240_v21, %v239_v19  ;;  %v278_v24 = vrot.slane %v277_v22, 1 }
  0xe8   :  { %242 = vst [vmem:[#allocation7] sm:$0x1] %v241_v23  ;;  %v279_v25 = vadd.f32 %v278_v24, %v277_v22 }
  0xea   :  { %280 = vst [vmem:[#allocation7 + $0x1] sm:$0x1] %v279_v25 }
  0xeb   :  { %291 = dma.vmem_to_hbm [thread:$0]  %s287_s1, 128, %s289_s23, [#allocation4]  }
  0xec   :  { %484 = dma.done.wait [#allocation4], 128  }
  0xed   :  { %485 = vsyncadd [#allocation4], 4294967168 }
  0xee   :  { %296 = vsyncpa [#allocation3], 1 }
  0xef   :  { %297 = vsyncpa [#allocation6], 1 }
  0xf0   :  { %298 = vsyncpa [#allocation4], 1 }

</bundles_post_ra>
